<compile_context>
chip_gen: v5e
topology: v5e:2x2
jax: 0.10.0
libtpu: 0.0.40
codegen_flags: <defaults>
</compile_context>

<pallas_src>
import numpy as np
import jax
import jax.numpy as jnp
from jax.experimental import pallas as pl
from jax.experimental.pallas import tpu as pltpu


# ---------------------------------------------------------------------------
# Deterministic construction of the `base` buffer (mirrors FNOClassifier.__init__)
# ---------------------------------------------------------------------------
def make_base(num_features: int, num_classes: int, seed: int = 0) -> np.ndarray:
    rng = np.random.RandomState(seed)
    rnd_indices = rng.permutation(np.arange(num_features))
    n = num_features // num_classes
    feat_indices = [rnd_indices[i * n:(i + 1) * n] for i in range(num_classes)]
    rem = num_features % num_classes
    rem_indices = rng.permutation(np.arange(num_classes))[:rem]
    for i, rem_idx in enumerate(rem_indices):
        feat_indices[rem_idx] = np.append(
            feat_indices[rem_idx], rnd_indices[num_classes * n + i])
    base = np.zeros((num_classes, num_features), dtype=np.float32)
    for i in range(num_classes):
        base[i][feat_indices[i]] = 1.0
    # F.normalize(base, dim=1): divide each row by max(||row||_2, 1e-12)
    norms = np.maximum(np.linalg.norm(base, axis=1, keepdims=True), 1e-12)
    return base / norms


def _round_up(x: int, m: int) -> int:
    return ((x + m - 1) // m) * m


# ---------------------------------------------------------------------------
# Pallas kernel: out_tile = sum_k x_tile(k) @ baseT_tile(k)   (f32 accumulate)
# ---------------------------------------------------------------------------
def _linear_kernel(x_ref, wT_ref, o_ref, acc_ref):
    # x_ref:  (tm, tk)     VMEM
    # wT_ref: (tk, C_pad)  VMEM
    # o_ref:  (tm, C_pad)  VMEM
    # acc_ref:(tm, C_pad)  VMEM f32 scratch, resident across the K axis
    k = pl.program_id(1)

    @pl.when(k == 0)
    def _():
        acc_ref[...] = jnp.zeros_like(acc_ref)

    acc_ref[...] += jnp.dot(x_ref[...], wT_ref[...],
                            preferred_element_type=jnp.float32)

    @pl.when(k == pl.num_programs(1) - 1)
    def _():
        o_ref[...] = acc_ref[...].astype(o_ref.dtype)


# ---------------------------------------------------------------------------
# One-time weight preparation: transpose + pad the fixed classifier matrix.
# ---------------------------------------------------------------------------
def prepare_base(base: jax.Array) -> jax.Array:
    """base: (C, F) -> lane-padded transposed weight (F_pad, C_pad), done once."""
    C, F = base.shape
    F_pad = _round_up(F, 128)
    C_pad = _round_up(max(C, 128), 128)
    wT = jnp.zeros((F_pad, C_pad), dtype=jnp.float32)
    wT = wT.at[:F, :C].set(jnp.asarray(base, jnp.float32).T)
    return wT


# ---------------------------------------------------------------------------
# Forward wrapper
# ---------------------------------------------------------------------------
def fno_classifier_forward(x: jax.Array, wT_pad: jax.Array, num_classes: int,
                           *, tm_target: int = 256, tk_target: int = 512
                           ) -> jax.Array:
    """x: (B, F) f32; wT_pad: (F_pad, C_pad) from prepare_base -> (B, C) f32."""
    x = x.astype(jnp.float32)
    B, F = x.shape
    F_pad, C_pad = wT_pad.shape
    assert F <= F_pad and num_classes <= C_pad

    # Batch tile: large (MXU-friendly), multiple of 8 sublanes, capped by B.
    tm = min(tm_target, _round_up(B, 8))
    B_pad = _round_up(B, tm)
    # Feature (K) tile: multiple of 128 lanes, capped by F_pad.
    tk = min(tk_target, F_pad)

    # Zero-pad x to (B_pad, F_pad); zero rows/cols contribute nothing.
    if B_pad != B or F_pad != F:
        x = jnp.pad(x, ((0, B_pad - B), (0, F_pad - F)))

    grid = (B_pad // tm, F_pad // tk)

    # Rough VMEM footprint: double-buffered x / wT / out blocks + f32 acc.
    vmem_bytes = (2 * tm * tk + 2 * tk * C_pad + 2 * tm * C_pad
                  + tm * C_pad) * 4
    vmem_limit = int(min(max(2 * vmem_bytes, 32 << 20), 96 << 20))

    out = pl.pallas_call(
        _linear_kernel,
        out_shape=jax.ShapeDtypeStruct((B_pad, C_pad), jnp.float32),
        grid_spec=pltpu.PrefetchScalarGridSpec(
            num_scalar_prefetch=0,
            grid=grid,
            in_specs=[
                pl.BlockSpec((tm, tk), lambda i, k: (i, k)),        # x tile
                pl.BlockSpec((tk, C_pad), lambda i, k: (k, 0)),     # baseT tile
            ],
            out_specs=pl.BlockSpec((tm, C_pad), lambda i, k: (i, 0)),
            scratch_shapes=[pltpu.VMEM((tm, C_pad), jnp.float32)],
        ),
        compiler_params=pltpu.CompilerParams(
            dimension_semantics=("parallel", "arbitrary"),
            vmem_limit_bytes=vmem_limit,
        ),
    )(x, wT_pad)

    # Slice away batch / class padding.
    return out[:B, :num_classes]


if __name__ == "__main__":
    # Small shapes consistent with the module's forward: x is (batch, num_features)
    batch, num_features, num_classes = 16, 64, 8

    base_np = make_base(num_features, num_classes, seed=0)
    base = jnp.asarray(base_np, dtype=jnp.float32)

    # Fixed weight prepared ONCE (transpose + lane padding) — not per call.
    wT_pad = jax.block_until_ready(prepare_base(base))

    key = jax.random.PRNGKey(0)
    x = jax.random.normal(key, (batch, num_features), dtype=jnp.float32)

    out = fno_classifier_forward(x, wT_pad, num_classes)
    out = jax.block_until_ready(out)

    # Correctness check against the plain-JAX reference of F.linear(x, base)
    ref = x @ base.T
    assert out.shape == (batch, num_classes)
    np.testing.assert_allclose(np.asarray(out), np.asarray(ref),
                               rtol=1e-5, atol=1e-5)

    print("KERNEL_OK")
</pallas_src>

<mosaic_0001>
module attributes {stable_mosaic.version = 11 : i64} {
  func.func @_linear_kernel(%arg0: i32, %arg1: i32, %arg2: memref<16x128xf32, #tpu.memory_space<vmem>>, %arg3: memref<128x128xf32, #tpu.memory_space<vmem>>, %arg4: memref<16x128xf32, #tpu.memory_space<vmem>>, %arg5: memref<16x128xf32, #tpu.memory_space<vmem>>) attributes {dimension_semantics = [#tpu.dimension_semantics<parallel>, #tpu.dimension_semantics<arbitrary>], iteration_bounds = array<i64: 1, 1>, scalar_prefetch = 0 : i64, scratch_operands = 1 : i64, tpu.core_type = #tpu.core_type<tc>, window_params = [{transform_indices = @transform_0, window_bounds = array<i64: 16, 128>}, {transform_indices = @transform_1, window_bounds = array<i64: 128, 128>}, {transform_indices = @transform_2, window_bounds = array<i64: 16, 128>}]} {
    %c0_i32 = arith.constant 0 : i32
    %0 = arith.cmpi eq, %arg1, %c0_i32 : i32
    %1 = arith.extui %0 : i1 to i32
    %c0_i32_0 = arith.constant 0 : i32
    %2 = arith.cmpi ne, %1, %c0_i32_0 : i32
    scf.if %2 {
      %cst_10 = arith.constant 0.000000e+00 : f32
      %12 = vector.broadcast %cst_10 : f32 to vector<16x128xf32>
      %c0_11 = arith.constant 0 : index
      %c0_12 = arith.constant 0 : index
      %13 = vector.load %arg5[%c0_11, %c0_12] : memref<16x128xf32, #tpu.memory_space<vmem>>, vector<16x128xf32>
      tpu.vector_store %arg5[%c0_11, %c0_12], %12 {strides = array<i32>} : memref<16x128xf32, #tpu.memory_space<vmem>>, vector<16x128xf32>,
    } else {
    }
    %c0 = arith.constant 0 : index
    %c0_1 = arith.constant 0 : index
    %3 = vector.load %arg5[%c0, %c0_1] : memref<16x128xf32, #tpu.memory_space<vmem>>, vector<16x128xf32>
    %c0_2 = arith.constant 0 : index
    %c0_3 = arith.constant 0 : index
    %4 = vector.load %arg2[%c0_2, %c0_3] : memref<16x128xf32, #tpu.memory_space<vmem>>, vector<16x128xf32>
    %c0_4 = arith.constant 0 : index
    %c0_5 = arith.constant 0 : index
    %5 = vector.load %arg3[%c0_4, %c0_5] : memref<128x128xf32, #tpu.memory_space<vmem>>, vector<128x128xf32>
    %cst = arith.constant dense<0.000000e+00> : vector<16x128xf32>
    %6 = tpu.matmul %4, %5, %cst {dimension_numbers = #tpu.dot_dimension_numbers<[1], [0], [0], [1], [0, 0, 1, 1], [], []>} : vector<16x128xf32>, vector<128x128xf32>, vector<16x128xf32> -> vector<16x128xf32>
    %7 = arith.addf %3, %6 : vector<16x128xf32>
    %c0_6 = arith.constant 0 : index
    %c0_7 = arith.constant 0 : index
    %8 = vector.load %arg5[%c0_6, %c0_7] : memref<16x128xf32, #tpu.memory_space<vmem>>, vector<16x128xf32>
    tpu.vector_store %arg5[%c0_6, %c0_7], %7 {strides = array<i32>} : memref<16x128xf32, #tpu.memory_space<vmem>>, vector<16x128xf32>,
    %c0_i32_8 = arith.constant 0 : i32
    %9 = arith.cmpi eq, %arg1, %c0_i32_8 : i32
    %10 = arith.extui %9 : i1 to i32
    %c0_i32_9 = arith.constant 0 : i32
    %11 = arith.cmpi ne, %10, %c0_i32_9 : i32
    scf.if %11 {
      %c0_10 = arith.constant 0 : index
      %c0_11 = arith.constant 0 : index
      %12 = vector.load %arg5[%c0_10, %c0_11] : memref<16x128xf32, #tpu.memory_space<vmem>>, vector<16x128xf32>
      %c0_12 = arith.constant 0 : index
      %c0_13 = arith.constant 0 : index
      %13 = vector.load %arg4[%c0_12, %c0_13] : memref<16x128xf32, #tpu.memory_space<vmem>>, vector<16x128xf32>
      tpu.vector_store %arg4[%c0_12, %c0_13], %12 {strides = array<i32>} : memref<16x128xf32, #tpu.memory_space<vmem>>, vector<16x128xf32>,
    } else {
    }
    return
  }
  func.func @transform_0(%arg0: i32, %arg1: i32) -> (i32, i32) {
    %c0_i32 = arith.constant 0 : i32
    return %arg0, %arg1 : i32, i32
  }
  func.func @transform_1(%arg0: i32, %arg1: i32) -> (i32, i32) {
    %c0_i32 = arith.constant 0 : i32
    %c0_i32_0 = arith.constant 0 : i32
    return %arg1, %c0_i32 : i32, i32
  }
  func.func @transform_2(%arg0: i32, %arg1: i32) -> (i32, i32) {
    %c0_i32 = arith.constant 0 : i32
    %c0_i32_0 = arith.constant 0 : i32
    return %arg0, %c0_i32 : i32, i32
  }
}

</mosaic_0001>

<bundles_post_ra>
// kernel: tpu_custom_call.1
= control target key start
LH: loop header
LB: loop body
LE: loop exit
PB: predicated region body
PF: predicated region fallthrough
CT: control target
= control target key end

     0   :  { %7 = vsyncpa [#allocation4], 0  ;;  %s261_s0 = inlined_call_operand.hbm [shape: f32[16,128], index: 0, kind: input, shape index: {}]   ;;  %s262_s1 = inlined_call_operand.hbm [shape: f32[128,128], index: 1, kind: input, shape index: {}]   ;;  %s263_s2 = inlined_call_operand.hbm [shape: f32[16,128], index: 2, kind: output, shape index: {}]  }
   0x1   :  { %8 = vsyncpa [#allocation7], 0 }
   0x2   :  { %9 = vsyncpa [#allocation5], 0  ;;  %s14_s11 = sshll.u32 %s261_s0, 4  ;;  %s223_s12 = smov [#allocation3]   ;;  %s15_s11 = int_to_ptr.hbm [resolvable:$true] %s14_s11 }
   0x3   :  { %s16_s13 = sshll.u32 %s223_s12, 4  ;;  %s27_s16 = sshll.u32 %s262_s1, 4  ;;  %s17_s13 = int_to_ptr.vmem [resolvable:$true] %s16_s13  ;;  %s28_s16 = int_to_ptr.hbm [resolvable:$true] %s27_s16 }
   0x4   :  { %s224_s17 = smov 128   ;;  %s225_s18 = smov 8  }
   0x5   :  { %22 = dma.hbm_to_vmem [thread:$0]  %s15_s11, 256, %s17_s13, [#allocation4], %s224_s17, %s224_s17, %s225_s18  }
   0x6   :  { %s226_s19 = smov [#allocation6]  }
   0x7   :  { %s29_s20 = sshll.u32 %s226_s19, 4  ;;  %s30_s20 = int_to_ptr.vmem [resolvable:$true] %s29_s20 }
   0x8   :  { %35 = dma.hbm_to_vmem [thread:$0]  %s28_s16, 2048, %s30_s20, [#allocation7], %s224_s17, %s224_s17, %s225_s18  }
   0x9   :  { %217 = dma.done.wait [#allocation4], 256  }
   0xa   :  { %218 = vsyncadd [#allocation4], 4294967040 }
   0xb   :  { %219 = dma.done.wait [#allocation7], 2048  }
   0xc   :  { %220 = vsyncadd [#allocation7], 4294965248  ;;  %v69_v0 = vld [vmem:[#allocation6 + $0x78] sm:$0xff]  ;;  %v68_v1 = vld [vmem:[#allocation6 + $0x70] sm:$0xff]  ;;  %s227_s0 = smov [#allocation8]   ;;  %s110_s23 = sshll.u32 %s263_s2, 4  ;;  %s111_s23 = int_to_ptr.hbm [resolvable:$true] %s110_s23 }
   0xd   :  { %70 = vmatpush.msra.mxu0 %v69_v0  ;;  %124 = vmatpush.msra.mxu1 %v69_v0  ;;  %v67_v2 = vld [vmem:[#allocation6 + $0x68] sm:$0xff]  ;;  %v66_v3 = vld [vmem:[#allocation6 + $0x60] sm:$0xff]  ;;  %v65_v4 = vld [vmem:[#allocation6 + $0x58] sm:$0xff]  ;;  %s108_s1 = sshll.u32 %s227_s0, 4  ;;  %s109_s1 = int_to_ptr.vmem [resolvable:$true] %s108_s1 }
   0xe   :  { %v64_v5 = vld [vmem:[#allocation6 + $0x50] sm:$0xff]  ;;  %v63_v6 = vld [vmem:[#allocation6 + $0x48] sm:$0xff]  ;;  %v62_v7 = vld [vmem:[#allocation6 + $0x40] sm:$0xff] }
   0xf   :  { %71 = vmatpush.msra.mxu0 %v68_v1  ;;  %125 = vmatpush.msra.mxu1 %v68_v1  ;;  %v61_v8 = vld [vmem:[#allocation6 + $0x38] sm:$0xff]  ;;  %v60_v9 = vld [vmem:[#allocation6 + $0x30] sm:$0xff]  ;;  %v59_v10 = vld [vmem:[#allocation6 + $0x28] sm:$0xff] }
  0x10   :  { %v58_v11 = vld [vmem:[#allocation6 + $0x20] sm:$0xff]  ;;  %v57_v12 = vld [vmem:[#allocation6 + $0x18] sm:$0xff]  ;;  %v56_v13 = vld [vmem:[#allocation6 + $0x10] sm:$0xff] }
  0x11   :  { %72 = vmatpush.msra.mxu0 %v67_v2  ;;  %126 = vmatpush.msra.mxu1 %v67_v2  ;;  %v55_v14 = vld [vmem:[#allocation6 + $0x8] sm:$0xff]  ;;  %v54_v15 = vld [vmem:[#allocation6] sm:$0xff]  ;;  %v52_v16 = vld [vmem:[#allocation3] sm:$0xff] }
  0x12   :  { %v53_v17 = vld [vmem:[#allocation3 + $0x8] sm:$0xff] }
  0x13   :  { %73 = vmatpush.msra.mxu0 %v66_v3  ;;  %127 = vmatpush.msra.mxu1 %v66_v3 }
  0x15   :  { %74 = vmatpush.msra.mxu0 %v65_v4  ;;  %128 = vmatpush.msra.mxu1 %v65_v4 }
  0x17   :  { %75 = vmatpush.msra.mxu0 %v64_v5  ;;  %129 = vmatpush.msra.mxu1 %v64_v5 }
  0x19   :  { %76 = vmatpush.msra.mxu0 %v63_v6  ;;  %130 = vmatpush.msra.mxu1 %v63_v6 }
  0x1b   :  { %77 = vmatpush.msra.mxu0 %v62_v7  ;;  %131 = vmatpush.msra.mxu1 %v62_v7 }
  0x1d   :  { %78 = vmatpush.msra.mxu0 %v61_v8  ;;  %132 = vmatpush.msra.mxu1 %v61_v8 }
  0x1f   :  { %79 = vmatpush.msra.mxu0 %v60_v9  ;;  %133 = vmatpush.msra.mxu1 %v60_v9 }
  0x21   :  { %80 = vmatpush.msra.mxu0 %v59_v10  ;;  %134 = vmatpush.msra.mxu1 %v59_v10 }
  0x23   :  { %81 = vmatpush.msra.mxu0 %v58_v11  ;;  %135 = vmatpush.msra.mxu1 %v58_v11 }
  0x25   :  { %82 = vmatpush.msra.mxu0 %v57_v12  ;;  %136 = vmatpush.msra.mxu1 %v57_v12 }
  0x27   :  { %83 = vmatpush.msra.mxu0 %v56_v13  ;;  %137 = vmatpush.msra.mxu1 %v56_v13 }
  0x29   :  { %84 = vmatpush.msra.mxu0 %v55_v14  ;;  %138 = vmatpush.msra.mxu1 %v55_v14 }
  0x2b   :  { %85 = vmatpush.msra.mxu0 %v54_v15  ;;  %139 = vmatpush.msra.mxu1 %v54_v15 }
  0x2c   :  { %86 = vmatmul.f32.vlgmr.msra.gmra.mxu0 %v52_v16  ;;  %89 = vmatmul.f32.vlgmr.msra.gmra.mxu1 %v53_v17 }
  0xa9   :  { %v87_v18 = vpop.f32.mrf.mxu0  ;;  %v90_v19 = vpop.f32.mrf.mxu1 }
  0xaa   :  { %102 = vst [vmem:[#allocation8] sm:$0xff] %v87_v18 }
  0xab   :  { %103 = vst [vmem:[#allocation8 + $0x8] sm:$0xff] %v90_v19 }
  0xac   :  { %116 = dma.vmem_to_hbm [thread:$0]  %s109_s1, 256, %s111_s23, [#allocation5], %s224_s17, %s224_s17, %s225_s18  }
  0xad   :  { %221 = dma.done.wait [#allocation5], 256  }
  0xae   :  { %222 = vsyncadd [#allocation5], 4294967040 }
  0xaf   :  { %121 = vsyncpa [#allocation4], 1 }
  0xb0   :  { %122 = vsyncpa [#allocation7], 1 }
  0xb1   :  { %123 = vsyncpa [#allocation5], 1 }

</bundles_post_ra>
